<compile_context>
chip_gen: v7x
topology: tpu7x:2x2x1
jax: 0.10.0
libtpu: 0.0.40
codegen_flags: <defaults>
</compile_context>

<pallas_src>
import jax
import jax.numpy as jnp
from jax import lax
from jax.experimental import pallas as pl
from jax.experimental.pallas import tpu as pltpu


def soilnet_kernel(x_ref, w1_ref, b1_ref, w2_ref, b2_ref,
                   w3_ref, b3_ref, w4_ref, b4_ref, o_ref):
    # x_ref: [TB, 12] float32 (native layout; batch on the sublane axis here).
    # Weights are bf16, biases f32, accumulation f32.
    x = x_ref[...].astype(jnp.bfloat16)

    # Layer 1: Linear(12, 64) + ReLU   (Dropout = identity in eval)
    # Contract the feature axis (dim 1) of both operands -> [64, TB];
    # the transpose of the x tile happens in VMEM (MXU trans_b path).
    h = lax.dot_general(w1_ref[...], x, (((1,), (1,)), ((), ())),
                        preferred_element_type=jnp.float32)
    h = jnp.maximum(h + b1_ref[...], 0.0)

    # Layer 2: Linear(64, 32) + ReLU   (Dropout = identity in eval)
    h = jnp.dot(w2_ref[...], h.astype(jnp.bfloat16),
                preferred_element_type=jnp.float32)
    h = jnp.maximum(h + b2_ref[...], 0.0)

    # Layer 3: Linear(32, 16) + ReLU
    h = jnp.dot(w3_ref[...], h.astype(jnp.bfloat16),
                preferred_element_type=jnp.float32)
    h = jnp.maximum(h + b3_ref[...], 0.0)

    # Layer 4: Linear(16, 3)  (no activation)
    out = jnp.dot(w4_ref[...], h.astype(jnp.bfloat16),
                  preferred_element_type=jnp.float32)
    o_ref[...] = (out + b4_ref[...]).astype(o_ref.dtype)


def _round_up(n, m):
    return ((n + m - 1) // m) * m


def soilnet_forward(x, params, *, block_b=8192):
    """x: [B, 12] float32 -> [B, 3] float32."""
    w1, b1, w2, b2, w3, b3, w4, b4 = params
    B, F = x.shape
    assert F == 12, x.shape

    # Batch tile: multiple of 128 lanes, capped at block_b.  block_b=8192
    # keeps the per-tile working set (~15-20 MiB incl. lane-padded input
    # buffer + double buffering) inside the explicit VMEM limit on every
    # generation.  For very large B the grid has many steps, which also keeps
    # both v7x TensorCores busy via dimension_semantics=("parallel",).
    tb = min(block_b, _round_up(max(B, 1), 128))
    grid = (pl.cdiv(B, tb),)

    # MXU is bf16-native: cast weights once here (tiny); biases stay f32.
    w1b, w2b, w3b, w4b = (w.astype(jnp.bfloat16) for w in (w1, w2, w3, w4))

    def resident(arr):
        # Full-array block, constant index map -> loaded once, stays in VMEM.
        return pl.BlockSpec(arr.shape, lambda i: (0, 0))

    out_t = pl.pallas_call(
        soilnet_kernel,
        out_shape=jax.ShapeDtypeStruct((3, B), jnp.float32),
        grid=grid,
        in_specs=[
            # x tile in native [B, 12] layout; ragged tail is bound-read.
            pl.BlockSpec((tb, 12), lambda i: (i, 0)),
            resident(w1b), resident(b1),
            resident(w2b), resident(b2),
            resident(w3b), resident(b3),
            resident(w4b), resident(b4),
        ],
        # Lane-dense [3, TB] output tile; ragged tail is mask-written.
        out_specs=pl.BlockSpec((3, tb), lambda i: (0, i)),
        compiler_params=pltpu.CompilerParams(
            dimension_semantics=("parallel",),
            # Above v5e's 16 MiB scoped default, below v7x's 64 MiB physical.
            vmem_limit_bytes=48 * 1024 * 1024),
    )(x, w1b, b1, w2b, b2, w3b, b3, w4b, b4)

    # Back to the PyTorch-facing [B, 3] layout (tiny HBM pass: B*3*4 bytes).
    return out_t.T


def init_params(key):
    """Deterministic init mimicking nn.Linear default (uniform +/- 1/sqrt(fan_in)).

    Weights are [out, in] (PyTorch layout), biases are [out, 1] so they
    broadcast over the lane (batch) axis inside the kernel.
    """
    dims = [(12, 64), (64, 32), (32, 16), (16, 3)]
    params = []
    for (fan_in, fan_out) in dims:
        key, kw, kb = jax.random.split(key, 3)
        bound = 1.0 / jnp.sqrt(float(fan_in))
        w = jax.random.uniform(kw, (fan_out, fan_in), jnp.float32, -bound, bound)
        b = jax.random.uniform(kb, (fan_out, 1), jnp.float32, -bound, bound)
        params.extend([w, b])
    return tuple(params)


def reference_forward(x, params):
    """Pure-JAX reference with the same bf16-operand / f32-accumulate matmuls."""
    w1, b1, w2, b2, w3, b3, w4, b4 = params

    def lin(h, w, b):
        return jnp.dot(h.astype(jnp.bfloat16), w.astype(jnp.bfloat16).T,
                       preferred_element_type=jnp.float32) + b[:, 0]

    h = jnp.maximum(lin(x, w1, b1), 0.0)
    h = jnp.maximum(lin(h, w2, b2), 0.0)
    h = jnp.maximum(lin(h, w3, b3), 0.0)
    return lin(h, w4, b4)


if __name__ == "__main__":
    key = jax.random.PRNGKey(0)
    key, kx = jax.random.split(key)
    batch = 8
    x = jax.random.normal(kx, (batch, 12), dtype=jnp.float32)
    params = init_params(key)

    out = jax.block_until_ready(soilnet_forward(x, params))
    ref = reference_forward(x, params)
    assert out.shape == (batch, 3), out.shape
    assert jnp.allclose(out, ref, atol=1e-2, rtol=1e-2), "mismatch vs reference"

    # Also exercise a batch that is NOT a multiple of the tile size
    # (ragged tail block: bound-read input, mask-written output).
    key, kx2 = jax.random.split(key)
    x2 = jax.random.normal(kx2, (300, 12), dtype=jnp.float32)
    out2 = jax.block_until_ready(soilnet_forward(x2, params, block_b=128))
    ref2 = reference_forward(x2, params)
    assert out2.shape == (300, 3), out2.shape
    assert jnp.allclose(out2, ref2, atol=1e-2, rtol=1e-2), "mismatch (ragged B)"

    print("KERNEL_OK")
</pallas_src>

<mosaic_0001>
module attributes {stable_mosaic.version = 11 : i64} {
  func.func @soilnet_kernel(%arg0: i32, %arg1: memref<128x12xf32, #tpu.memory_space<vmem>>, %arg2: memref<64x12xbf16, #tpu.memory_space<vmem>>, %arg3: memref<64x1xf32, #tpu.memory_space<vmem>>, %arg4: memref<32x64xbf16, #tpu.memory_space<vmem>>, %arg5: memref<32x1xf32, #tpu.memory_space<vmem>>, %arg6: memref<16x32xbf16, #tpu.memory_space<vmem>>, %arg7: memref<16x1xf32, #tpu.memory_space<vmem>>, %arg8: memref<3x16xbf16, #tpu.memory_space<vmem>>, %arg9: memref<3x1xf32, #tpu.memory_space<vmem>>, %arg10: memref<3x128xf32, #tpu.memory_space<vmem>>) attributes {dimension_semantics = [#tpu.dimension_semantics<parallel>], iteration_bounds = array<i64: 1>, scalar_prefetch = 0 : i64, scratch_operands = 0 : i64, tpu.core_type = #tpu.core_type<tc>, window_params = [{transform_indices = @transform_0, window_bounds = array<i64: 128, 12>}, {pipeline_mode = #tpu.pipeline_mode<synchronous>, transform_indices = @transform_1, window_bounds = array<i64: 64, 12>}, {pipeline_mode = #tpu.pipeline_mode<synchronous>, transform_indices = @transform_2, window_bounds = array<i64: 64, 1>}, {pipeline_mode = #tpu.pipeline_mode<synchronous>, transform_indices = @transform_3, window_bounds = array<i64: 32, 64>}, {pipeline_mode = #tpu.pipeline_mode<synchronous>, transform_indices = @transform_4, window_bounds = array<i64: 32, 1>}, {pipeline_mode = #tpu.pipeline_mode<synchronous>, transform_indices = @transform_5, window_bounds = array<i64: 16, 32>}, {pipeline_mode = #tpu.pipeline_mode<synchronous>, transform_indices = @transform_6, window_bounds = array<i64: 16, 1>}, {pipeline_mode = #tpu.pipeline_mode<synchronous>, transform_indices = @transform_7, window_bounds = array<i64: 3, 16>}, {pipeline_mode = #tpu.pipeline_mode<synchronous>, transform_indices = @transform_8, window_bounds = array<i64: 3, 1>}, {transform_indices = @transform_9, window_bounds = array<i64: 3, 128>}]} {
    %c0 = arith.constant 0 : index
    %c0_0 = arith.constant 0 : index
    %0 = vector.load %arg1[%c0, %c0_0] : memref<128x12xf32, #tpu.memory_space<vmem>>, vector<128x12xf32>
    %1 = arith.truncf %0 : vector<128x12xf32> to vector<128x12xbf16>
    %c0_1 = arith.constant 0 : index
    %c0_2 = arith.constant 0 : index
    %2 = vector.load %arg2[%c0_1, %c0_2] : memref<64x12xbf16, #tpu.memory_space<vmem>>, vector<64x12xbf16>
    %cst = arith.constant dense<0.000000e+00> : vector<64x128xf32>
    %3 = tpu.matmul %2, %1, %cst {dimension_numbers = #tpu.dot_dimension_numbers<[1], [1], [0], [0], [0, 0, 1, 0], [], []>} : vector<64x12xbf16>, vector<128x12xbf16>, vector<64x128xf32> -> vector<64x128xf32>
    %c0_3 = arith.constant 0 : index
    %c0_4 = arith.constant 0 : index
    %4 = vector.load %arg3[%c0_3, %c0_4] : memref<64x1xf32, #tpu.memory_space<vmem>>, vector<64x1xf32>
    %5 = vector.broadcast %4 : vector<64x1xf32> to vector<64x128xf32>
    %6 = arith.addf %3, %5 : vector<64x128xf32>
    %cst_5 = arith.constant 0.000000e+00 : f32
    %7 = vector.broadcast %cst_5 : f32 to vector<64x128xf32>
    %8 = arith.maximumf %6, %7 : vector<64x128xf32>
    %c0_6 = arith.constant 0 : index
    %c0_7 = arith.constant 0 : index
    %9 = vector.load %arg4[%c0_6, %c0_7] : memref<32x64xbf16, #tpu.memory_space<vmem>>, vector<32x64xbf16>
    %10 = arith.truncf %8 : vector<64x128xf32> to vector<64x128xbf16>
    %cst_8 = arith.constant dense<0.000000e+00> : vector<32x128xf32>
    %11 = tpu.matmul %9, %10, %cst_8 {dimension_numbers = #tpu.dot_dimension_numbers<[1], [0], [0], [1], [0, 0, 1, 1], [], []>} : vector<32x64xbf16>, vector<64x128xbf16>, vector<32x128xf32> -> vector<32x128xf32>
    %c0_9 = arith.constant 0 : index
    %c0_10 = arith.constant 0 : index
    %12 = vector.load %arg5[%c0_9, %c0_10] : memref<32x1xf32, #tpu.memory_space<vmem>>, vector<32x1xf32>
    %13 = vector.broadcast %12 : vector<32x1xf32> to vector<32x128xf32>
    %14 = arith.addf %11, %13 : vector<32x128xf32>
    %cst_11 = arith.constant 0.000000e+00 : f32
    %15 = vector.broadcast %cst_11 : f32 to vector<32x128xf32>
    %16 = arith.maximumf %14, %15 : vector<32x128xf32>
    %c0_12 = arith.constant 0 : index
    %c0_13 = arith.constant 0 : index
    %17 = vector.load %arg6[%c0_12, %c0_13] : memref<16x32xbf16, #tpu.memory_space<vmem>>, vector<16x32xbf16>
    %18 = arith.truncf %16 : vector<32x128xf32> to vector<32x128xbf16>
    %cst_14 = arith.constant dense<0.000000e+00> : vector<16x128xf32>
    %19 = tpu.matmul %17, %18, %cst_14 {dimension_numbers = #tpu.dot_dimension_numbers<[1], [0], [0], [1], [0, 0, 1, 1], [], []>} : vector<16x32xbf16>, vector<32x128xbf16>, vector<16x128xf32> -> vector<16x128xf32>
    %c0_15 = arith.constant 0 : index
    %c0_16 = arith.constant 0 : index
    %20 = vector.load %arg7[%c0_15, %c0_16] : memref<16x1xf32, #tpu.memory_space<vmem>>, vector<16x1xf32>
    %21 = vector.broadcast %20 : vector<16x1xf32> to vector<16x128xf32>
    %22 = arith.addf %19, %21 : vector<16x128xf32>
    %cst_17 = arith.constant 0.000000e+00 : f32
    %23 = vector.broadcast %cst_17 : f32 to vector<16x128xf32>
    %24 = arith.maximumf %22, %23 : vector<16x128xf32>
    %c0_18 = arith.constant 0 : index
    %c0_19 = arith.constant 0 : index
    %25 = vector.load %arg8[%c0_18, %c0_19] : memref<3x16xbf16, #tpu.memory_space<vmem>>, vector<3x16xbf16>
    %26 = arith.truncf %24 : vector<16x128xf32> to vector<16x128xbf16>
    %cst_20 = arith.constant dense<0.000000e+00> : vector<3x128xf32>
    %27 = tpu.matmul %25, %26, %cst_20 {dimension_numbers = #tpu.dot_dimension_numbers<[1], [0], [0], [1], [0, 0, 1, 1], [], []>} : vector<3x16xbf16>, vector<16x128xbf16>, vector<3x128xf32> -> vector<3x128xf32>
    %c0_21 = arith.constant 0 : index
    %c0_22 = arith.constant 0 : index
    %28 = vector.load %arg9[%c0_21, %c0_22] : memref<3x1xf32, #tpu.memory_space<vmem>>, vector<3x1xf32>
    %29 = vector.broadcast %28 : vector<3x1xf32> to vector<3x128xf32>
    %30 = arith.addf %27, %29 : vector<3x128xf32>
    %c0_23 = arith.constant 0 : index
    %c0_24 = arith.constant 0 : index
    %31 = vector.load %arg10[%c0_23, %c0_24] : memref<3x128xf32, #tpu.memory_space<vmem>>, vector<3x128xf32>
    tpu.vector_store %arg10[%c0_23, %c0_24], %30 {strides = array<i32>} : memref<3x128xf32, #tpu.memory_space<vmem>>, vector<3x128xf32>,
    return
  }
  func.func @transform_0(%arg0: i32) -> (i32, i32) {
    %c0_i32 = arith.constant 0 : i32
    %c0_i32_0 = arith.constant 0 : i32
    return %arg0, %c0_i32 : i32, i32
  }
  func.func @transform_1(%arg0: i32) -> (i32, i32) {
    %c0_i32 = arith.constant 0 : i32
    %c0_i32_0 = arith.constant 0 : i32
    %c0_i32_1 = arith.constant 0 : i32
    return %c0_i32, %c0_i32_0 : i32, i32
  }
  func.func @transform_2(%arg0: i32) -> (i32, i32) {
    %c0_i32 = arith.constant 0 : i32
    %c0_i32_0 = arith.constant 0 : i32
    %c0_i32_1 = arith.constant 0 : i32
    return %c0_i32, %c0_i32_0 : i32, i32
  }
  func.func @transform_3(%arg0: i32) -> (i32, i32) {
    %c0_i32 = arith.constant 0 : i32
    %c0_i32_0 = arith.constant 0 : i32
    %c0_i32_1 = arith.constant 0 : i32
    return %c0_i32, %c0_i32_0 : i32, i32
  }
  func.func @transform_4(%arg0: i32) -> (i32, i32) {
    %c0_i32 = arith.constant 0 : i32
    %c0_i32_0 = arith.constant 0 : i32
    %c0_i32_1 = arith.constant 0 : i32
    return %c0_i32, %c0_i32_0 : i32, i32
  }
  func.func @transform_5(%arg0: i32) -> (i32, i32) {
    %c0_i32 = arith.constant 0 : i32
    %c0_i32_0 = arith.constant 0 : i32
    %c0_i32_1 = arith.constant 0 : i32
    return %c0_i32, %c0_i32_0 : i32, i32
  }
  func.func @transform_6(%arg0: i32) -> (i32, i32) {
    %c0_i32 = arith.constant 0 : i32
    %c0_i32_0 = arith.constant 0 : i32
    %c0_i32_1 = arith.constant 0 : i32
    return %c0_i32, %c0_i32_0 : i32, i32
  }
  func.func @transform_7(%arg0: i32) -> (i32, i32) {
    %c0_i32 = arith.constant 0 : i32
    %c0_i32_0 = arith.constant 0 : i32
    %c0_i32_1 = arith.constant 0 : i32
    return %c0_i32, %c0_i32_0 : i32, i32
  }
  func.func @transform_8(%arg0: i32) -> (i32, i32) {
    %c0_i32 = arith.constant 0 : i32
    %c0_i32_0 = arith.constant 0 : i32
    %c0_i32_1 = arith.constant 0 : i32
    return %c0_i32, %c0_i32_0 : i32, i32
  }
  func.func @transform_9(%arg0: i32) -> (i32, i32) {
    %c0_i32 = arith.constant 0 : i32
    %c0_i32_0 = arith.constant 0 : i32
    return %c0_i32, %arg0 : i32, i32
  }
}

</mosaic_0001>

<bundles_post_ra>
// kernel: tpu_custom_call.1
= control target key start
LH: loop header
LB: loop body
LE: loop exit
PB: predicated region body
PF: predicated region fallthrough
CT: control target
= control target key end

     0   :  { %vm134_vm0 = vcmask 97280   ;;  %v614_v5 = vmov 0   ;;  %s821_s0 = inlined_call_operand.vmem [shape: f32[8,12], index: 0, kind: input, shape index: {}]   ;;  %s822_s1 = inlined_call_operand.vmem [shape: bf16[64,12], index: 1, kind: input, shape index: {}]   ;;  %s823_s2 = inlined_call_operand.vmem [shape: f32[64,1], index: 2, kind: input, shape index: {}]   ;;  %s824_s3 = inlined_call_operand.vmem [shape: bf16[32,64], index: 3, kind: input, shape index: {}]   ;;  %s825_s4 = inlined_call_operand.vmem [shape: f32[32,1], index: 4, kind: input, shape index: {}]   ;;  %s826_s5 = inlined_call_operand.vmem [shape: bf16[16,32], index: 5, kind: input, shape index: {}]   ;;  %s827_s6 = inlined_call_operand.vmem [shape: f32[16,1], index: 6, kind: input, shape index: {}]   ;;  %s828_s7 = inlined_call_operand.vmem [shape: bf16[3,16], index: 7, kind: input, shape index: {}]   ;;  %s829_s8 = inlined_call_operand.vmem [shape: f32[3,1], index: 8, kind: input, shape index: {}]   ;;  %s830_s9 = inlined_call_operand.hbm [shape: f32[3,8], index: 9, kind: output, shape index: {}]  }
   0x1   :  { %v34_v0 = vld [vmem:[%s821_s0] sm:$0xff]  ;;  %v35_v1 = vld [vmem:[%s821_s0 + $0x8] sm:$0xff]  ;;  %v36_v2 = vld [vmem:[%s821_s0 + $0x10] sm:$0xff]  ;;  %581 = vset.pattern.permute.xlu0 %v614_v5  ;;  %582 = vset.pattern.permute.xlu1 %v614_v5 }
   0x2   :  { %v50_v3 = vpack.c.bf16 %v35_v1, %v34_v0  ;;  %v37_v4 = vld [vmem:[%s821_s0 + $0x18] sm:$0xff]  ;;  %v38_v8 = vld [vmem:[%s821_s0 + $0x20] sm:$0xff]  ;;  %v39_v9 = vld [vmem:[%s821_s0 + $0x28] sm:$0xff] }
   0x3   :  { %v51_v6 = vpack.c.bf16 %v37_v4, %v36_v2  ;;  %v583_v10 = vld [vmem:[%s822_s1] sm:$0xff]   ;;  %v52_v12 = vpack.c.bf16 %v39_v9, %v38_v8  ;;  %v68_v14 = vld [vmem:[%s823_s2 + $0x10] sm:$0xff]  ;;  %v67_v15 = vld [vmem:[%s823_s2 + $0x8] sm:$0xff] }
   0x4   :  { %569 = vmatprep.subr.msk.bf16.mxu0 %vm134_vm0, %v50_v3  ;;  %v148_v7 = vsel %vm134_vm0, %v50_v3, 0  ;;  %535 = vmatprep.mubr.msk.bf16.mxu0 %vm134_vm0, %v583_v10  ;;  %v66_v13 = vld [vmem:[%s823_s2] sm:$0xff]  ;;  %v69_v16 = vld [vmem:[%s823_s2 + $0x18] sm:$0xff]  ;;  %v40_v17 = vld [vmem:[%s821_s0 + $0x30] sm:$0xff] }
   0x5   :  { %520 = vmatpush3.bf16.xpose.msra.mxu0 %v148_v7  ;;  %v151_v11 = vsel %vm134_vm0, %v51_v6, 0  ;;  %76 = vperm.xlu0 %581, %v66_v13   ;;  %v41_v18 = vld [vmem:[%s821_s0 + $0x38] sm:$0xff]  ;;  %v70_v19 = vld [vmem:[%s823_s2 + $0x20] sm:$0xff]  ;;  %v71_v20 = vld [vmem:[%s823_s2 + $0x28] sm:$0xff] }
   0x6   :  { %570 = vmatprep.subr.msk.bf16.mxu0 %vm134_vm0, %v51_v6  ;;  %86 = vperm.xlu1 %582, %v68_v14  }
   0x9   :  { %81 = vperm.xlu0 %581, %v67_v15  }
   0xa   :  { %91 = vperm.xlu1 %582, %v69_v16  }
   0xd   :  { %522 = vmatpush3.bf16.xpose.msra.mxu0 %v151_v11 }
   0xe   :  { %571 = vmatprep.subr.msk.bf16.mxu0 %vm134_vm0, %v52_v12 }
   0xf   :  { %14 = vsyncpa [#allocation3], 0  ;;  %v154_v21 = vsel %vm134_vm0, %v52_v12, 0  ;;  %v53_v22 = vpack.c.bf16 %v41_v18, %v40_v17  ;;  %96 = vperm.xlu0 %581, %v70_v19   ;;  %v72_v23 = vld [vmem:[%s823_s2 + $0x30] sm:$0xff]  ;;  %101 = vperm.xlu1 %582, %v71_v20   ;;  %v73_v24 = vld [vmem:[%s823_s2 + $0x38] sm:$0xff]  ;;  %vm286_vm1 = vcmask 523264  }
  0x10   :  { %v42_v25 = vld [vmem:[%s821_s0 + $0x40] sm:$0xff]  ;;  %v43_v26 = vld [vmem:[%s821_s0 + $0x48] sm:$0xff]  ;;  %v254_v31 = vld [vmem:[%s825_s4 + $0x10] sm:$0xff]  ;;  %vm616_vm2 = vmmov 0   ;;  %vm367_vm3 = vcmask 261120   ;;  %vm422_vm4 = vcmask 130048  }
  0x11   :  { %v252_v27 = vld [vmem:[%s825_s4] sm:$0xff]  ;;  %v253_v28 = vld [vmem:[%s825_s4 + $0x8] sm:$0xff]  ;;  %v157_v29 = vsel %vm134_vm0, %v53_v22, 0  ;;  %v54_v30 = vpack.c.bf16 %v43_v26, %v42_v25  ;;  %v255_v32 = vld [vmem:[%s825_s4 + $0x18] sm:$0xff]  ;;  %v615_v26 = vmov 0.0   ;;  %s617_s15 = smov [#allocation2]  }
  0x12   :  { %v44_v33 = vld [vmem:[%s821_s0 + $0x50] sm:$0xff]  ;;  %v45_v34 = vld [vmem:[%s821_s0 + $0x58] sm:$0xff]  ;;  %v350_v35 = vld [vmem:[%s827_s6] sm:$0xff]  ;;  %s473_s16 = sshll.u32 %s617_s15, 4  ;;  %s474_s16 = int_to_ptr.vmem [resolvable:$true] %s473_s16 }
  0x13   :  { %106 = vperm.xlu0 %581, %v72_v23   ;;  %111 = vperm.xlu1 %582, %v73_v24   ;;  %v351_v36 = vld [vmem:[%s827_s6 + $0x8] sm:$0xff]  ;;  %v160_v37 = vsel %vm134_vm0, %v54_v30, 0  ;;  %v55_v38 = vpack.c.bf16 %v45_v34, %v44_v33  ;;  %v416_v39 = vld [vmem:[%s829_s8] sm:$0x7]  ;;  %v48_v44 = vld [vmem:[%s821_s0 + $0x70] sm:$0xff]  ;;  %s590_s17 = scalar_lea.vmem %s474_s16, 64  ;;  %p595_p1 = scmp.lt.s32.totalorder %s474_s16, %s474_s16 }
  0x14   :  { %v46_v40 = vld [vmem:[%s821_s0 + $0x60] sm:$0xff]  ;;  %v47_v41 = vld [vmem:[%s821_s0 + $0x68] sm:$0xff]  ;;  %v49_v45 = vld [vmem:[%s821_s0 + $0x78] sm:$0xff]  ;;  %p591_p0 = scmp.ne.s32.totalorder %s474_s16, %s590_s17  ;;  %p596_p2 = scmp.lt.s32.totalorder %s590_s17, %s590_s17 }
  0x15   :  { %524 = vmatpush3.bf16.xpose.msra.mxu0 %v154_v21  ;;  %v163_v42 = vsel %vm134_vm0, %v55_v38, 0  ;;  %v56_v43 = vpack.c.bf16 %v47_v41, %v46_v40  ;;  %v57_v47 = vpack.c.bf16 %v49_v45, %v48_v44  ;;  %v584_v49 = vld [vmem:[%s822_s1 + $0x8] sm:$0xff]   ;;  %v585_v50 = vld [vmem:[%s822_s1 + $0x10] sm:$0xff]   ;;  %v586_v51 = vld [vmem:[%s822_s1 + $0x18] sm:$0xff]  }
  0x16   :  { %572 = vmatprep.subr.msk.bf16.mxu0 %vm134_vm0, %v53_v22  ;;  %v587_v52 = vld [vmem:[%s824_s3] sm:$0xff]   ;;  %v588_v25 = vld [vmem:[%s824_s3 + $0x8] sm:$0xff]   ;;  %p597_p3 = por %p596_p2, %p595_p1 }
  0x17   :  { %258 = vperm.xlu0 %581, %v252_v27   ;;  %263 = vperm.xlu1 %582, %v253_v28   ;;  %v166_v46 = vsel %vm134_vm0, %v56_v43, 0  ;;  %v169_v48 = vsel %vm134_vm0, %v57_v47, 0  ;;  %v589_v45 = vld [vmem:[%s826_s5] sm:$0xff]  }
  0x18   :  { %551 = vmatprep.mubr.msk.bf16.mxu1 %vm286_vm1, %v587_v52  ;;  %p598_p4 = pnand %p597_p3, %p591_p0 }
  0x1b   :  { %268 = vperm.xlu0 %581, %v254_v31   ;;  %273 = vperm.xlu1 %582, %v255_v32  }
  0x1d   :  { %526 = vmatpush3.bf16.xpose.msra.mxu0 %v157_v29 }
  0x1e   :  { %573 = vmatprep.subr.msk.bf16.mxu0 %vm134_vm0, %v54_v30 }
  0x1f   :  { %354 = vperm.xlu0 %581, %v350_v35   ;;  %359 = vperm.xlu1 %582, %v351_v36  }
  0x23   :  { %419 = vperm.xlu0 %581, %v416_v39  }
  0x25   :  { %528 = vmatpush3.bf16.xpose.msra.mxu0 %v160_v37 }
  0x26   :  { %574 = vmatprep.subr.msk.bf16.mxu0 %vm134_vm0, %v55_v38 }
  0x2d   :  { %530 = vmatpush3.bf16.xpose.msra.mxu0 %v163_v42 }
  0x2e   :  { %575 = vmatprep.subr.msk.bf16.mxu0 %vm134_vm0, %v56_v43 }
  0x35   :  { %532 = vmatpush3.bf16.xpose.msra.mxu0 %v166_v46 }
  0x36   :  { %576 = vmatprep.subr.msk.bf16.mxu0 %vm134_vm0, %v57_v47 }
  0x3d   :  { %534 = vmatpush3.bf16.xpose.msra.mxu0 %v169_v48 }
  0x44   :  { %536 = vmatmul.mubr.msk.bf16.vlgmr.msra.gmra.mrb[0].mxu0 %vm134_vm0, %v584_v49 }
  0x45   :  { %539 = vmatprep.mubr.msk.bf16.mxu0 %vm134_vm0, %v585_v50 }
  0x4c   :  { %540 = vmatmul.mubr.msk.bf16.gmra.mrb[4].mxu0 %vm134_vm0, %v586_v51 }
  0x84   :  { %v77_v53 = vpop.permute.xlu0 %76 }
  0x85   :  { %v87_v54 = vpop.permute.xlu1 %86 }
  0x88   :  { %v82_v55 = vpop.permute.xlu0 %81 }
  0x89   :  { %v92_v56 = vpop.permute.xlu1 %91 }
  0x8e   :  { %v97_v60 = vpop.permute.xlu0 %96  ;;  %v102_v1 = vpop.permute.xlu1 %101 }
  0x92   :  { %v107_v8 = vpop.permute.xlu0 %106  ;;  %v112_v13 = vpop.permute.xlu1 %111 }
  0x96   :  { %v259_v27 = vpop.permute.xlu0 %258  ;;  %v264_v28 = vpop.permute.xlu1 %263 }
  0x9a   :  { %v269_v29 = vpop.permute.xlu0 %268  ;;  %v274_v33 = vpop.permute.xlu1 %273 }
  0x9e   :  { %v355_v46 = vpop.permute.xlu0 %354  ;;  %v360_v50 = vpop.permute.xlu1 %359 }
 0x117   :  { %v537_v57 = vpop.f32.mrb[0].mxu0 }
 0x118   :  { %v214_v58 = vadd.f32 %v537_v57, %v87_v54  ;;  %v205_v59 = vpop.f32.mrb[1].mxu0  ;;  %v414_v57 = vld [vmem:[%s828_s7] sm:$0x3] }
 0x119   :  { %v206_v61 = vadd.f32 %v205_v59, %v77_v53  ;;  %v538_v62 = vpop.f32.mrb[2].mxu0 }
 0x11a   :  { %v217_v63 = vadd.f32 %v538_v62, %v92_v56  ;;  %v208_v0 = vpop.f32.mrb[3].mxu0  ;;  %v238_v3 = vmax.f32 %v214_v58, 0.0  ;;  %v420_v58 = vpop.permute.xlu0 %419 }
 0x11b   :  { %v209_v2 = vadd.f32 %v208_v0, %v82_v55  ;;  %v236_v5 = vmax.f32 %v206_v61, 0.0 }
 0x11c   :  { %v239_v4 = vmax.f32 %v217_v63, 0.0 }
 0x11d   :  { %v237_v6 = vmax.f32 %v209_v2, 0.0 }
 0x11e   :  { %v249_v7 = vpack.c.bf16 %v239_v4, %v238_v3 }
 0x11f   :  { %v541_v9 = vpop.f32.mrb[4].mxu0  ;;  %v248_v10 = vpack.c.bf16 %v237_v6, %v236_v5 }
 0x120   :  { %v230_v11 = vadd.f32 %v541_v9, %v107_v8  ;;  %v221_v12 = vpop.f32.mrb[5].mxu0 }
 0x121   :  { %v222_v14 = vadd.f32 %v221_v12, %v97_v60  ;;  %v542_v15 = vpop.f32.mrb[6].mxu0  ;;  %543 = vmatprep.subr.bf16.mxu1 %v248_v10 }
 0x122   :  { %v233_v16 = vadd.f32 %v542_v15, %v112_v13  ;;  %v224_v17 = vpop.f32.mrb[7].mxu0  ;;  %544 = vmatpush3.bf16.msra.mxu1 %v248_v10  ;;  %v242_v19 = vmax.f32 %v230_v11, 0.0 }
 0x123   :  { %v225_v18 = vadd.f32 %v224_v17, %v102_v1  ;;  %545 = vmatprep.subr.bf16.mxu1 %v249_v7  ;;  %v240_v21 = vmax.f32 %v222_v14, 0.0 }
 0x124   :  { %v243_v20 = vmax.f32 %v233_v16, 0.0 }
 0x125   :  { %v241_v22 = vmax.f32 %v225_v18, 0.0 }
 0x126   :  { %v251_v23 = vpack.c.bf16 %v243_v20, %v242_v19  ;;  %546 = vmatpush3.bf16.msra.mxu1 %v249_v7 }
 0x127   :  { %v250_v24 = vpack.c.bf16 %v241_v22, %v240_v21 }
 0x129   :  { %547 = vmatprep.subr.bf16.mxu1 %v250_v24 }
 0x12a   :  { %548 = vmatpush3.bf16.msra.mxu1 %v250_v24 }
 0x12b   :  { %549 = vmatprep.subr.bf16.mxu1 %v251_v23 }
 0x12e   :  { %550 = vmatpush3.bf16.msra.mxu1 %v251_v23 }
 0x12f   :  { %555 = vmatprep.subr.bf16.mxu1 %v615_v26 }
 0x131   :  { %552 = vmatmul.mubr.msk.bf16.vlgmr.msra.gmra.mrb[0].mxu1 %vm286_vm1, %v588_v25 }
 0x132   :  { %559 = vmatprep.mubr.msk.bf16.mxu1 %vm616_vm2, %v615_v26 }
 0x204   :  { %v553_v30 = vpop.f32.mrb[0].mxu1 }
 0x205   :  { %v336_v31 = vadd.f32 %v553_v30, %v269_v29  ;;  %v327_v32 = vpop.f32.mrb[1].mxu1 }
 0x206   :  { %v328_v34 = vadd.f32 %v327_v32, %v259_v27  ;;  %v554_v35 = vpop.f32.mrb[2].mxu1 }
 0x207   :  { %v339_v36 = vadd.f32 %v554_v35, %v274_v33  ;;  %v330_v37 = vpop.f32.mrb[3].mxu1  ;;  %v344_v39 = vmax.f32 %v336_v31, 0.0 }
 0x208   :  { %v331_v38 = vadd.f32 %v330_v37, %v264_v28  ;;  %v342_v41 = vmax.f32 %v328_v34, 0.0 }
 0x209   :  { %v345_v40 = vmax.f32 %v339_v36, 0.0 }
 0x20a   :  { %v343_v42 = vmax.f32 %v331_v38, 0.0 }
 0x20b   :  { %v349_v43 = vpack.c.bf16 %v345_v40, %v344_v39 }
 0x20c   :  { %v348_v44 = vpack.c.bf16 %v343_v42, %v342_v41 }
 0x20e   :  { %556 = vmatpush3.bf16.msra.mxu1 %v348_v44 }
 0x20f   :  { %557 = vmatprep.subr.bf16.mxu1 %v615_v26 }
 0x212   :  { %558 = vmatpush3.bf16.msra.mxu1 %v349_v43 }
 0x213   :  { %563 = vmatprep.subr.bf16.mxu1 %v615_v26 }
 0x215   :  { %560 = vmatmul.mubr.msk.bf16.vlgmr.msra.gmra.mrb[4].mxu1 %vm367_vm3, %v589_v45 }
 0x216   :  { %565 = vmatprep.mubr.msk.bf16.mxu1 %vm616_vm2, %v615_v26 }
 0x2e8   :  { %v405_v47 = vpop.f32.mrb[4].mxu1 }
 0x2e9   :  { %v406_v48 = vadd.f32 %v405_v47, %v355_v46  ;;  %v561_v49 = vpop.f32.mrb[5].mxu1 }
 0x2ea   :  { %v408_v51 = vpop.f32.mrb[6].mxu1 }
 0x2eb   :  { %v409_v52 = vadd.f32 %v408_v51, %v360_v50  ;;  %v562_v53 = vpop.f32.mrb[7].mxu1  ;;  %v412_v54 = vmax.f32 %v406_v48, 0.0 }
 0x2ed   :  { %v413_v55 = vmax.f32 %v409_v52, 0.0 }
 0x2ef   :  { %v415_v56 = vpack.c.bf16 %v413_v55, %v412_v54 }
 0x2f1   :  { %564 = vmatpush3.bf16.msra.mxu1 %v415_v56 }
 0x2f4   :  { %566 = vmatmul.mubr.msk.bf16.vlgmr.msra.gmra.mrb[8].mxu1 %vm422_vm4, %v414_v57 }
 0x3c7   :  { %v460_v59 = vpop.f32.mrb[8].mxu1 }
 0x3c8   :  { %v461_v60 = vadd.f32 %v460_v59, %v420_v58  ;;  %v567_v61 = vpop.f32.mrb[9].mxu1 }
 0x3c9   :  { %v463_v62 = vpop.f32.mrb[10].mxu1 }
 0x3ca   :  { %466 = vst [vmem:[#allocation2] sm:$0x7] %v461_v60  ;;  %v568_v63 = vpop.f32.mrb[11].mxu1 }
 0x3cb   :  { %601 = shalt.err (!%p598_p4)
}
 0x3cc   :  { %s602_s19 = scalar_lea.hbm %s830_s9, 64 }
 0x3cd   :  { %p603_p5 = scmp.ne.s32.totalorder %s830_s9, %s602_s19  ;;  %p606_p6 = scmp.lt.u32.totalorder %s602_s19, %s830_s9 }
 0x3cf   :  { %p608_p7 = pnand %p606_p6, %p603_p5 }
 0x3d1   :  { %611 = shalt.err (!%p608_p7)
}
 0x3d2   :  { %476 = dma.vmem_to_hbm [thread:$0]  %s474_s16, 64, %s830_s9, [#allocation3]  }
 0x3d3   :  { %612 = dma.done.wait [#allocation3], 64  }
 0x3d4   :  { %613 = vsyncadd [#allocation3], 4294967232 }
 0x3d5   :  { %480 = vsyncpa [#allocation3], 1 }

</bundles_post_ra>
